<compile_context>
chip_gen: v6e
topology: v6e:2x2x1
jax: 0.10.0
libtpu: 0.0.40
codegen_flags: <defaults>
</compile_context>

<pallas_src>
import jax
import jax.numpy as jnp
from jax.experimental import pallas as pl
from jax.experimental.pallas import tpu as pltpu


def _cnn_text_fused_kernel(x_ref, w_ref, b_ref, mask_ref, fcw_ref, fcb_ref, out_ref):
    """One grid step == one batch example.

    x_ref:    (L_pad, E)        bf16  shared padded embeddings (Kmax-1 zeros each side)
    w_ref:    (Kmax, E, F_total) bf16 all branches fused along the F axis
    b_ref:    (1, F_total)      f32   fused conv biases
    mask_ref: (T, F_total)      f32   1.0 where position t is valid for that branch
    fcw_ref:  (F_total, C)      f32   final Linear weight
    fcb_ref:  (1, C)            f32   final Linear bias
    out_ref:  (1, C)            f32   logits for this example
    """
    Kmax = w_ref.shape[0]
    F_total = w_ref.shape[2]
    T = mask_ref.shape[0]                      # = L + Kmax - 1 output positions

    # Conv: one (T, E) @ (E, F_total) MXU matmul per tap, f32 accumulation.
    acc = jnp.zeros((T, F_total), jnp.float32)
    for k in range(Kmax):                      # Kmax small & static -> unrolled
        acc = acc + jnp.dot(
            x_ref[k:k + T, :],                 # (T, E) bf16
            w_ref[k],                          # (E, F_total) bf16
            preferred_element_type=jnp.float32,
        )

    # Bias + ReLU once over the whole tile, then mask out positions that do not
    # exist for shorter filter sizes (they would otherwise contribute relu(bias)).
    act = jnp.maximum(acc + b_ref[...], 0.0) * mask_ref[...]     # (T, F_total)

    # Global max-pool over time -> (1, F_total) pooled features (kept in VMEM).
    feat = jnp.max(act, axis=0, keepdims=True)

    # Final Linear (dropout is identity in eval mode).
    out_ref[...] = (
        jnp.dot(feat, fcw_ref[...], preferred_element_type=jnp.float32)
        + fcb_ref[...]
    )


def cnn_text_forward(tokens, emb_table, conv_ws, conv_bs, fc_w, fc_b, Ks):
    B, L = tokens.shape
    E = emb_table.shape[1]
    F = conv_ws[0].shape[2]
    n_branch = len(Ks)
    F_total = n_branch * F
    C = fc_w.shape[1]
    Kmax = max(Ks)
    L_pad = L + 2 * (Kmax - 1)          # shared padding for ALL branches
    T = L + Kmax - 1                    # conv output length of the widest branch

    # Embedding gather + single shared padded buffer (JAX glue).
    # TODO(synk): for large vocab / long L, move the gather into the kernel via
    # PrefetchScalarGridSpec (token ids as scalar prefetch) to avoid the HBM
    # round trip of the (B, L, E) embedding tensor.
    emb = emb_table[tokens].astype(jnp.bfloat16)                         # (B, L, E)
    x_pad = jnp.pad(emb, ((0, 0), (Kmax - 1, Kmax - 1), (0, 0)))         # (B, L_pad, E)

    # Fuse all branches: branch i's K_i taps are right-aligned inside Kmax taps;
    # build its validity mask over the T shared output positions.
    w_all = jnp.zeros((Kmax, E, F_total), jnp.float32)
    b_all = jnp.zeros((1, F_total), jnp.float32)
    mask = jnp.zeros((T, F_total), jnp.float32)
    t_idx = jnp.arange(T)
    for i, (K, w, bias) in enumerate(zip(Ks, conv_ws, conv_bs)):
        w_all = w_all.at[Kmax - K:, :, i * F:(i + 1) * F].set(w)
        b_all = b_all.at[:, i * F:(i + 1) * F].set(bias)
        valid = (t_idx < (L + K - 1)).astype(jnp.float32)                # (T,)
        mask = mask.at[:, i * F:(i + 1) * F].set(
            jnp.broadcast_to(valid[:, None], (T, F)))
    w_all = w_all.astype(jnp.bfloat16)

    out = pl.pallas_call(
        _cnn_text_fused_kernel,
        out_shape=jax.ShapeDtypeStruct((B, 1, C), jnp.float32),
        grid=(B,),
        in_specs=[
            pl.BlockSpec((None, L_pad, E), lambda bi: (bi, 0, 0)),       # per-example tile
            pl.BlockSpec((Kmax, E, F_total), lambda bi: (0, 0, 0)),      # resident weights
            pl.BlockSpec((1, F_total), lambda bi: (0, 0)),
            pl.BlockSpec((T, F_total), lambda bi: (0, 0)),
            pl.BlockSpec((F_total, C), lambda bi: (0, 0)),
            pl.BlockSpec((1, C), lambda bi: (0, 0)),
        ],
        out_specs=pl.BlockSpec((None, 1, C), lambda bi: (bi, 0, 0)),
        compiler_params=pltpu.CompilerParams(
            dimension_semantics=("parallel",)),
    )(x_pad, w_all, b_all, mask, fc_w, fc_b)
    return out.reshape(B, C)


def _reference_forward(tokens, emb_table, conv_ws, conv_bs, fc_w, fc_b, Ks):
    """Pure-JAX f32 reference matching the PyTorch module's forward."""
    emb = emb_table[tokens]
    feats = []
    for K, w, b in zip(Ks, conv_ws, conv_bs):
        x_pad = jnp.pad(emb, ((0, 0), (K - 1, K - 1), (0, 0)))
        L_out = x_pad.shape[1] - K + 1
        conv = jnp.zeros((tokens.shape[0], L_out, w.shape[2]), jnp.float32)
        for k in range(K):
            conv = conv + jnp.einsum("ble,ef->blf", x_pad[:, k:k + L_out, :], w[k])
        conv = jnp.maximum(conv + b[None, :, :], 0.0)
        feats.append(jnp.max(conv, axis=1))
    feat = jnp.concatenate(feats, axis=1)
    return feat @ fc_w + fc_b


if __name__ == "__main__":
    # Small, forward-consistent config.
    vocab_size = 50
    emb_dim = 32        # E
    n_filters = 16      # F
    Ks = (2, 3, 4)      # filter_sizes
    class_num = 2
    B, L = 2, 16

    key = jax.random.PRNGKey(0)
    k_emb, k_tok, k_fcw, k_fcb, *k_convs = jax.random.split(key, 4 + 2 * len(Ks))

    emb_table = jax.random.normal(k_emb, (vocab_size, emb_dim), jnp.float32)
    conv_ws = [
        0.1 * jax.random.normal(k_convs[2 * i], (K, emb_dim, n_filters), jnp.float32)
        for i, K in enumerate(Ks)
    ]
    conv_bs = [
        0.1 * jax.random.normal(k_convs[2 * i + 1], (1, n_filters), jnp.float32)
        for i, _ in enumerate(Ks)
    ]
    fc_w = 0.1 * jax.random.normal(k_fcw, (len(Ks) * n_filters, class_num), jnp.float32)
    fc_b = 0.1 * jax.random.normal(k_fcb, (1, class_num), jnp.float32)

    tokens = jax.random.randint(k_tok, (B, L), 0, vocab_size, dtype=jnp.int32)

    fwd = jax.jit(
        lambda t: cnn_text_forward(t, emb_table, conv_ws, conv_bs, fc_w, fc_b, Ks)
    )
    out = fwd(tokens)
    jax.block_until_ready(out)

    ref = _reference_forward(tokens, emb_table, conv_ws, conv_bs, fc_w, fc_b, Ks)
    assert out.shape == (B, class_num), out.shape
    # bf16 activations/weights with f32 accumulation -> loosened tolerance.
    assert jnp.allclose(out, ref, rtol=5e-2, atol=5e-2), (out, ref)

    print("KERNEL_OK")
</pallas_src>

<mosaic_0001>
module attributes {stable_mosaic.version = 11 : i64} {
  func.func @_cnn_text_fused_kernel(%arg0: i32, %arg1: memref<1x22x32xbf16, #tpu.memory_space<vmem>>, %arg2: memref<4x32x48xbf16, #tpu.memory_space<vmem>>, %arg3: memref<1x48xf32, #tpu.memory_space<vmem>>, %arg4: memref<19x48xf32, #tpu.memory_space<vmem>>, %arg5: memref<48x2xf32, #tpu.memory_space<vmem>>, %arg6: memref<1x2xf32, #tpu.memory_space<vmem>>, %arg7: memref<1x1x2xf32, #tpu.memory_space<vmem>>) attributes {dimension_semantics = [#tpu.dimension_semantics<parallel>], iteration_bounds = array<i64: 2>, scalar_prefetch = 0 : i64, scratch_operands = 0 : i64, tpu.core_type = #tpu.core_type<tc>, window_params = [{transform_indices = @transform_0, window_bounds = array<i64: 1, 22, 32>}, {pipeline_mode = #tpu.pipeline_mode<synchronous>, transform_indices = @transform_1, window_bounds = array<i64: 4, 32, 48>}, {pipeline_mode = #tpu.pipeline_mode<synchronous>, transform_indices = @transform_2, window_bounds = array<i64: 1, 48>}, {pipeline_mode = #tpu.pipeline_mode<synchronous>, transform_indices = @transform_3, window_bounds = array<i64: 19, 48>}, {pipeline_mode = #tpu.pipeline_mode<synchronous>, transform_indices = @transform_4, window_bounds = array<i64: 48, 2>}, {pipeline_mode = #tpu.pipeline_mode<synchronous>, transform_indices = @transform_5, window_bounds = array<i64: 1, 2>}, {transform_indices = @transform_6, window_bounds = array<i64: 1, 1, 2>}]} {
    %cst = arith.constant 0.000000e+00 : f32
    %0 = vector.broadcast %cst : f32 to vector<19x48xf32>
    %c0 = arith.constant 0 : index
    %c0_0 = arith.constant 0 : index
    %c0_1 = arith.constant 0 : index
    %1 = vector.load %arg1[%c0, %c0_0, %c0_1] : memref<1x22x32xbf16, #tpu.memory_space<vmem>>, vector<1x19x32xbf16>
    %2 = vector.shape_cast %1 : vector<1x19x32xbf16> to vector<19x32xbf16>
    %c0_2 = arith.constant 0 : index
    %c0_3 = arith.constant 0 : index
    %c0_4 = arith.constant 0 : index
    %3 = vector.load %arg2[%c0_2, %c0_3, %c0_4] : memref<4x32x48xbf16, #tpu.memory_space<vmem>>, vector<1x32x48xbf16>
    %4 = vector.shape_cast %3 : vector<1x32x48xbf16> to vector<32x48xbf16>
    %cst_5 = arith.constant dense<0.000000e+00> : vector<19x48xf32>
    %5 = tpu.matmul %2, %4, %cst_5 {dimension_numbers = #tpu.dot_dimension_numbers<[1], [0], [0], [1], [0, 0, 1, 1], [], []>} : vector<19x32xbf16>, vector<32x48xbf16>, vector<19x48xf32> -> vector<19x48xf32>
    %6 = arith.addf %0, %5 : vector<19x48xf32>
    %c0_6 = arith.constant 0 : index
    %c1 = arith.constant 1 : index
    %c0_7 = arith.constant 0 : index
    %7 = vector.load %arg1[%c0_6, %c1, %c0_7] : memref<1x22x32xbf16, #tpu.memory_space<vmem>>, vector<1x19x32xbf16>
    %8 = vector.shape_cast %7 : vector<1x19x32xbf16> to vector<19x32xbf16>
    %c1_8 = arith.constant 1 : index
    %c0_9 = arith.constant 0 : index
    %c0_10 = arith.constant 0 : index
    %9 = vector.load %arg2[%c1_8, %c0_9, %c0_10] : memref<4x32x48xbf16, #tpu.memory_space<vmem>>, vector<1x32x48xbf16>
    %10 = vector.shape_cast %9 : vector<1x32x48xbf16> to vector<32x48xbf16>
    %cst_11 = arith.constant dense<0.000000e+00> : vector<19x48xf32>
    %11 = tpu.matmul %8, %10, %cst_11 {dimension_numbers = #tpu.dot_dimension_numbers<[1], [0], [0], [1], [0, 0, 1, 1], [], []>} : vector<19x32xbf16>, vector<32x48xbf16>, vector<19x48xf32> -> vector<19x48xf32>
    %12 = arith.addf %6, %11 : vector<19x48xf32>
    %c0_12 = arith.constant 0 : index
    %c2 = arith.constant 2 : index
    %c0_13 = arith.constant 0 : index
    %13 = vector.load %arg1[%c0_12, %c2, %c0_13] : memref<1x22x32xbf16, #tpu.memory_space<vmem>>, vector<1x19x32xbf16>
    %14 = vector.shape_cast %13 : vector<1x19x32xbf16> to vector<19x32xbf16>
    %c2_14 = arith.constant 2 : index
    %c0_15 = arith.constant 0 : index
    %c0_16 = arith.constant 0 : index
    %15 = vector.load %arg2[%c2_14, %c0_15, %c0_16] : memref<4x32x48xbf16, #tpu.memory_space<vmem>>, vector<1x32x48xbf16>
    %16 = vector.shape_cast %15 : vector<1x32x48xbf16> to vector<32x48xbf16>
    %cst_17 = arith.constant dense<0.000000e+00> : vector<19x48xf32>
    %17 = tpu.matmul %14, %16, %cst_17 {dimension_numbers = #tpu.dot_dimension_numbers<[1], [0], [0], [1], [0, 0, 1, 1], [], []>} : vector<19x32xbf16>, vector<32x48xbf16>, vector<19x48xf32> -> vector<19x48xf32>
    %18 = arith.addf %12, %17 : vector<19x48xf32>
    %c0_18 = arith.constant 0 : index
    %c3 = arith.constant 3 : index
    %c0_19 = arith.constant 0 : index
    %19 = vector.load %arg1[%c0_18, %c3, %c0_19] : memref<1x22x32xbf16, #tpu.memory_space<vmem>>, vector<1x19x32xbf16>
    %20 = vector.shape_cast %19 : vector<1x19x32xbf16> to vector<19x32xbf16>
    %c3_20 = arith.constant 3 : index
    %c0_21 = arith.constant 0 : index
    %c0_22 = arith.constant 0 : index
    %21 = vector.load %arg2[%c3_20, %c0_21, %c0_22] : memref<4x32x48xbf16, #tpu.memory_space<vmem>>, vector<1x32x48xbf16>
    %22 = vector.shape_cast %21 : vector<1x32x48xbf16> to vector<32x48xbf16>
    %cst_23 = arith.constant dense<0.000000e+00> : vector<19x48xf32>
    %23 = tpu.matmul %20, %22, %cst_23 {dimension_numbers = #tpu.dot_dimension_numbers<[1], [0], [0], [1], [0, 0, 1, 1], [], []>} : vector<19x32xbf16>, vector<32x48xbf16>, vector<19x48xf32> -> vector<19x48xf32>
    %24 = arith.addf %18, %23 : vector<19x48xf32>
    %c0_24 = arith.constant 0 : index
    %c0_25 = arith.constant 0 : index
    %25 = vector.load %arg3[%c0_24, %c0_25] : memref<1x48xf32, #tpu.memory_space<vmem>>, vector<1x48xf32>
    %26 = vector.broadcast %25 : vector<1x48xf32> to vector<19x48xf32>
    %27 = arith.addf %24, %26 : vector<19x48xf32>
    %cst_26 = arith.constant 0.000000e+00 : f32
    %28 = vector.broadcast %cst_26 : f32 to vector<19x48xf32>
    %29 = arith.maximumf %27, %28 : vector<19x48xf32>
    %c0_27 = arith.constant 0 : index
    %c0_28 = arith.constant 0 : index
    %30 = vector.load %arg4[%c0_27, %c0_28] : memref<19x48xf32, #tpu.memory_space<vmem>>, vector<19x48xf32>
    %31 = arith.mulf %29, %30 : vector<19x48xf32>
    %cst_29 = arith.constant dense<0xFF800000> : vector<48xf32>
    %32 = vector.multi_reduction <maximumf>, %31, %cst_29 [0] : vector<19x48xf32> to vector<48xf32>
    %33 = vector.shape_cast %32 : vector<48xf32> to vector<1x48xf32>
    %c0_30 = arith.constant 0 : index
    %c0_31 = arith.constant 0 : index
    %34 = vector.load %arg5[%c0_30, %c0_31] : memref<48x2xf32, #tpu.memory_space<vmem>>, vector<48x2xf32>
    %cst_32 = arith.constant dense<0.000000e+00> : vector<1x2xf32>
    %35 = tpu.matmul %33, %34, %cst_32 {dimension_numbers = #tpu.dot_dimension_numbers<[1], [0], [0], [1], [0, 0, 1, 1], [], []>} : vector<1x48xf32>, vector<48x2xf32>, vector<1x2xf32> -> vector<1x2xf32>
    %c0_33 = arith.constant 0 : index
    %c0_34 = arith.constant 0 : index
    %36 = vector.load %arg6[%c0_33, %c0_34] : memref<1x2xf32, #tpu.memory_space<vmem>>, vector<1x2xf32>
    %37 = arith.addf %35, %36 : vector<1x2xf32>
    %c0_35 = arith.constant 0 : index
    %c0_36 = arith.constant 0 : index
    %c0_37 = arith.constant 0 : index
    %38 = vector.load %arg7[%c0_35, %c0_36, %c0_37] : memref<1x1x2xf32, #tpu.memory_space<vmem>>, vector<1x1x2xf32>
    %39 = vector.shape_cast %38 : vector<1x1x2xf32> to vector<1x2xf32>
    %40 = vector.shape_cast %37 : vector<1x2xf32> to vector<1x1x2xf32>
    tpu.vector_store %arg7[%c0_35, %c0_36, %c0_37], %40 {strides = array<i32>} : memref<1x1x2xf32, #tpu.memory_space<vmem>>, vector<1x1x2xf32>,
    return
  }
  func.func @transform_0(%arg0: i32) -> (i32, i32, i32) {
    %c0_i32 = arith.constant 0 : i32
    %c0_i32_0 = arith.constant 0 : i32
    %c0_i32_1 = arith.constant 0 : i32
    return %arg0, %c0_i32, %c0_i32_0 : i32, i32, i32
  }
  func.func @transform_1(%arg0: i32) -> (i32, i32, i32) {
    %c0_i32 = arith.constant 0 : i32
    %c0_i32_0 = arith.constant 0 : i32
    %c0_i32_1 = arith.constant 0 : i32
    %c0_i32_2 = arith.constant 0 : i32
    return %c0_i32, %c0_i32_0, %c0_i32_1 : i32, i32, i32
  }
  func.func @transform_2(%arg0: i32) -> (i32, i32) {
    %c0_i32 = arith.constant 0 : i32
    %c0_i32_0 = arith.constant 0 : i32
    %c0_i32_1 = arith.constant 0 : i32
    return %c0_i32, %c0_i32_0 : i32, i32
  }
  func.func @transform_3(%arg0: i32) -> (i32, i32) {
    %c0_i32 = arith.constant 0 : i32
    %c0_i32_0 = arith.constant 0 : i32
    %c0_i32_1 = arith.constant 0 : i32
    return %c0_i32, %c0_i32_0 : i32, i32
  }
  func.func @transform_4(%arg0: i32) -> (i32, i32) {
    %c0_i32 = arith.constant 0 : i32
    %c0_i32_0 = arith.constant 0 : i32
    %c0_i32_1 = arith.constant 0 : i32
    return %c0_i32, %c0_i32_0 : i32, i32
  }
  func.func @transform_5(%arg0: i32) -> (i32, i32) {
    %c0_i32 = arith.constant 0 : i32
    %c0_i32_0 = arith.constant 0 : i32
    %c0_i32_1 = arith.constant 0 : i32
    return %c0_i32, %c0_i32_0 : i32, i32
  }
  func.func @transform_6(%arg0: i32) -> (i32, i32, i32) {
    %c0_i32 = arith.constant 0 : i32
    %c0_i32_0 = arith.constant 0 : i32
    %c0_i32_1 = arith.constant 0 : i32
    return %arg0, %c0_i32, %c0_i32_0 : i32, i32, i32
  }
}

</mosaic_0001>

<bundles_post_ra>
// kernel: _lambda_.1
= control target key start
LH: loop header
LB: loop body
LE: loop exit
PB: predicated region body
PF: predicated region fallthrough
CT: control target
= control target key end

     0   :  { %11 = vsyncpa [#allocation3], 0  ;;  %s1203_s0 = inlined_call_operand.vmem [shape: bf16[2,22,32], index: 0, kind: input, shape index: {}]   ;;  %s1204_s1 = inlined_call_operand.vmem [shape: bf16[4,32,48], index: 1, kind: input, shape index: {}]   ;;  %s1205_s2 = inlined_call_operand.vmem [shape: f32[1,48], index: 2, kind: input, shape index: {}]   ;;  %s1206_s3 = inlined_call_operand.vmem [shape: f32[19,48], index: 3, kind: input, shape index: {}]   ;;  %s1207_s4 = inlined_call_operand.vmem [shape: f32[48,2], index: 4, kind: input, shape index: {}]   ;;  %s1208_s5 = inlined_call_operand.vmem [shape: f32[1,2], index: 5, kind: input, shape index: {}]   ;;  %s1209_s6 = inlined_call_operand.hbm [shape: f32[2,1,2], index: 6, kind: output, shape index: {}]  }
   0x1   :  { %13 = vsyncpa [#allocation3 + $0x1], 0  ;;  %s1043_s21 = smov 0   ;;  %s1045_s22 = smov 0  }
   0x2   :  { %s1047_s23 = smov 0   ;;  %s1049_s24 = smov 0  }
   0x3 LB: > { %s1064_s25 = sadd.s32 4294967295, %s1003_s24   ;;  %s777_s26 = sadd.s32 4294967294, %s1003_s24   ;;  %s1003_s24 = sphi %s1049_s24, %s1215_s24   ;;  %s999_s23 = sphi %s1047_s23, %s1214_s23   ;;  %s995_s22 = sphi %s1045_s22, %s1213_s22   ;;  %s991_s21 = sphi %s1043_s21, %s1212_s21  }
   0x4   : > { %s1068_s27 = sadd.s32 1, %s1003_s24   ;;  %s157_s28 = sadd.s32 1, %s999_s23 }
   0x5   : > { %s154_s29 = ssub.s32 %s1003_s24, %s1068_s27  ;;  %p167_p0 = scmp.ne.s32.totalorder %s999_s23, %s995_s22 }
   0x6   : > { %p155_p1 = scmp.eq.s32.totalorder %s154_s29, 0  ;;  %p168_p2 = scmp.eq.s32.totalorder %s1064_s25, 1 }
   0x7   : > { %p173_p3 = scmp.ne.s32.totalorder %s995_s22, %s991_s21  ;;  %p174_p4 = scmp.eq.s32.totalorder %s777_s26, 1 }
   0x8   : > { %s1079_s30 = scalar_select %p155_p1, %s999_s23, %s157_s28  }
   0x9   : > { %p1081_p5 = por %p168_p2, %p167_p0  ;;  %p1085_p6 = por %p174_p4, %p173_p3 }
   0xa   : > { %p780_p7 = scmp.ge.s32.totalorder %s1003_s24, 1  ;;  %p215_p8 = scmp.lt.s32.totalorder %s1003_s24, 3 }
   0xc   : > { %p216_p9 = pnand %p780_p7, %p215_p8 }
   0xd   : > { %p244_p10 = scmp.lt.s32.totalorder (!%p216_p9), %s1064_s25, 1  ;;  %s242_s20 = sand.u32 (!%p216_p9), 1, %s995_s22  }
   0xe   : > { %219 = sbr.rel (%p216_p9) target bundleno = 477 (0x1dd), region = 44  ;;  %s243_s9 = scalar_lea.vmem (!%p216_p9), [#allocation2], %s242_s20 }
   0xf   : > { %s722_s10 = sshll.u32 (!%p216_p9), %s243_s9, 4  ;;  %s710_s14 = scalar_lea.sflag (!%p216_p9), [#allocation3], %s242_s20  ;;  %s723_s10 = int_to_ptr.vmem [resolvable:$true] %s722_s10 }
  0x13   : > { %v931_v0 = vld [vmem:[%s1204_s1 + $0x8] sm:$0xff]   ;;  %v932_v1 = vld [vmem:[%s1204_s1 + $0x18] sm:$0xff]   ;;  %v933_v2 = vld [vmem:[%s1204_s1] sm:$0xff]   ;;  %s245_s15 = scalar_select %p244_p10, %s1064_s25, 1  ;;  %vm298_vm0 = vcmask 261120   ;;  %vm430_vm1 = vcmask 1046528  }
  0x14   : > { %850 = vmatprep.subr.bf16.mxu1 %v931_v0  ;;  %842 = vmatprep.subr.bf16.mxu0 %v932_v1  ;;  %v934_v3 = vld [vmem:[%s1204_s1 + $0x10] sm:$0xff]   ;;  %v938_v4 = vld [vmem:[%s1204_s1 + $0x38] sm:$0xff]   ;;  %v939_v5 = vld [vmem:[%s1204_s1 + $0x28] sm:$0xff]   ;;  %vm270_vm2 = vsmask.f32 7424  ;;  %v1005_v39 = vmov 0.0  }
  0x15   : > { %851 = vmatpush3.bf16.msra.mxu1 %v931_v0  ;;  %843 = vmatpush3.bf16.msra.mxu0 %v932_v1  ;;  %s889_s18 = smul.u32 12, %s245_s15  ;;  %v940_v12 = vld [vmem:[%s1204_s1 + $0x30] sm:$0xff]   ;;  %v941_v33 = vld [vmem:[%s1204_s1 + $0x20] sm:$0xff]   ;;  %vm508_vm3 = vsmask.f32 6400  ;;  %v632_v38 = vld [vmem:[%s1207_s4 + $0x28] sm:$0xff] }
  0x16   : > { %852 = vmatprep.subr.bf16.mxu1 %v933_v2  ;;  %844 = vmatprep.subr.bf16.mxu0 %v934_v3  ;;  %v631_v40 = vld [vmem:[%s1207_s4 + $0x20] sm:$0xff]  ;;  %vm1006_vm4 = vmmov 0   ;;  %v630_v41 = vld [vmem:[%s1207_s4 + $0x18] sm:$0xff]  ;;  %v629_v42 = vld [vmem:[%s1207_s4 + $0x10] sm:$0xff]  ;;  %vm614_vm5 = vcmask 392192   ;;  %vm617_vm6 = vcmask 387072  }
  0x17   : > { %s248_s29 = scalar_lea.vmem %s1203_s0, %s889_s18  ;;  %v628_v43 = vld [vmem:[%s1207_s4 + $0x8] sm:$0xff]  ;;  %v627_v44 = vld [vmem:[%s1207_s4] sm:$0xff]  ;;  %vm707_vm7 = vcmask 8192   ;;  %s943_s15 = scalar_lea.vmem %s723_s10, 16 }
  0x18   : > { %v250_v6 = vld [vmem:[%s248_s29] sm:$0xf]  ;;  %v251_v7 = vld [vmem:[%s248_s29 + $0x4] sm:$0xf]  ;;  %p944_p11 = scmp.ne.s32.totalorder %s723_s10, %s943_s15 }
  0x19   : > { %853 = vmatpush3.bf16.msra.mxu1 %v933_v2  ;;  %v417_v8 = vld [vmem:[%s248_s29] sm:$0xe]  ;;  %v786_v9 = vcombine.low %v250_v6, %v251_v7  ;;  %845 = vmatpush3.bf16.msra.mxu0 %v934_v3  ;;  %v937_v11 = vld [vmem:[%s248_s29 + $0x8] ss:$0 sps:$4 sm:$0x33]  }
  0x1a   : > { %v800_v10 = vcombine.low %v417_v8, %v251_v7  ;;  %866 = vmatprep.subr.bf16.mxu1 %v938_v4  ;;  %858 = vmatprep.subr.bf16.mxu0 %v939_v5  ;;  %v279_v15 = vshll.u32 %v937_v11, 16  ;;  %v283_v16 = vshrl.u32 %v937_v11, 16  ;;  %v942_v17 = vld [vmem:[%s248_s29 + $0x8] ss:$0 sps:$4 sm:$0x77]   ;;  %s816_s29 = sshll.u32 %s1064_s25, 4  ;;  %p945_p12 = pnand %p944_p11, %p1081_p5 }
  0x1b   : > { %854 = vmatprep.mubr.msk.bf16.mxu1 %vm298_vm0, %v786_v9  ;;  %v272_v13 = vshrl.u32 %v786_v9, 16  ;;  %v274_v14 = vshll.u32 %v786_v9, 16  ;;  %v518_v24 = vshrl.u32 %v942_v17, 16  ;;  %v521_v25 = vshll.u32 %v942_v17, 16  ;;  %v814_v63 = vld [vmem:[%s1205_s2] ss:$0 sm:$0xff]  ;;  %s1168_s13 = scalar_lea.hbm %s1209_s6, %s816_s29 }
  0x1c   : > { %855 = vmatmul.mubr.msk.bf16.vlgmr.msra.gmra.mxu1 %vm298_vm0, %v937_v11  ;;  %v510_v18 = vshrl.u32 %v800_v10, 16  ;;  %v281_v20 = vrot.slane %v279_v15, 1  ;;  %v513_v21 = vshll.u32 %v800_v10, 16  ;;  %v431_v22 = vrot.slane %v800_v10, 1  ;;  %v608_v10 = vld [vmem:[%s1206_s3] sm:$0xff]  ;;  %p946_p13 = pneg %p945_p12  ;;  %s1007_s25 = smov [#allocation2]  }
  0x1d   : > { %867 = vmatpush3.bf16.msra.mxu1 %v938_v4  ;;  %v276_v19 = vrot.slane %v274_v14, 1  ;;  %v432_v26 = vrot.slane %v942_v17, 1  ;;  %v520_v30 = vrot.slane %v518_v24, 1  ;;  %v523_v31 = vrot.slane %v521_v25, 2  ;;  %v609_v14 = vld [vmem:[%s1206_s3 + $0x8] sm:$0xff]  ;;  %s947_s16 = sshll.u32 %s1007_s25, 4  ;;  %s948_s16 = int_to_ptr.vmem [resolvable:$false] %s947_s16 }
  0x1e   : > { %868 = vmatprep.subr.bf16.mxu1 %v940_v12  ;;  %v512_v23 = vrot.slane %v510_v18, 1  ;;  %v285_v28 = vor.u32 %v283_v16, %v281_v20  ;;  %v515_v29 = vrot.slane %v513_v21, 2  ;;  %s949_s17 = scalar_lea.vmem %s948_s16, 32  ;;  %p950_p0 = scmp.lt.s32.totalorder %s723_s10, %s948_s16 }
  0x1f   : > { %v277_v27 = vor.u32 %v276_v19, %v272_v13  ;;  %v433_v35 = vsel %vm430_vm1, %v431_v22, %v432_v26  ;;  %v524_v36 = vor.u32 %v523_v31, %v520_v30  ;;  %v610_v13 = vld [vmem:[%s1206_s3 + $0x10] sm:$0x7]  ;;  %v633_v30 = vld [vmem:[%s1208_s5] sm:$0x1]  ;;  %p951_p1 = scmp.lt.s32.totalorder %s949_s17, %s943_s15 }
  0x20   : > { %v516_v34 = vor.u32 %v515_v29, %v512_v23 }
  0x21   : > { %v282_v32 = vsel %vm270_vm2, %v277_v27, %v281_v20  ;;  %869 = vmatpush3.bf16.msra.mxu1 %v940_v12  ;;  %p952_p2 = por %p951_p1, %p950_p0 }
  0x22   : > { %846 = vmatprep.mubr.msk.bf16.mxu0 %vm298_vm0, %v282_v32  ;;  %v525_v37 = vsel %vm508_vm3, %v516_v34, %v524_v36 }
  0x23   : > { %847 = vmatmul.mubr.msk.bf16.vlgmr.msra.gmra.mxu0 %vm298_vm0, %v285_v28  ;;  %870 = vmatprep.mubr.msk.bf16.mxu1 %vm298_vm0, %v525_v37  ;;  %p953_p3 = pnand %p952_p2, %p946_p13 }
  0x24   : > { %859 = vmatpush3.bf16.msra.mxu0 %v939_v5  ;;  %862 = vmatprep.mubr.msk.bf16.mxu0 %vm298_vm0, %v433_v35 }
  0x25   : > { %860 = vmatprep.subr.bf16.mxu0 %v941_v33  ;;  %871 = vmatmul.mubr.msk.bf16.vlgmr.msra.gmra.mxu1 %vm298_vm0, %v524_v36 }
  0x28   : > { %861 = vmatpush3.bf16.msra.mxu0 %v941_v33 }
  0x29   : > { %874 = vmatprep.subr.mxu0 %v1005_v39 }
  0x2b   : > { %863 = vmatmul.mubr.msk.bf16.vlgmr.msra.gmra.mxu0 %vm298_vm0, %v432_v26 }
  0x2c   : > { %886 = vmatprep.mubr.msk.f32.mxu0 %vm1006_vm4, %v1005_v39  ;;  %875 = vmatpush3.msra.mxu0 %v632_v38 }
  0x2d   : > { %876 = vmatprep.subr.mxu0 %v1005_v39 }
  0x2e   : > { %877 = vmatpush3.msra.mxu0 %v631_v40 }
  0x2f   : > { %878 = vmatprep.subr.mxu0 %v1005_v39 }
  0x30   : > { %879 = vmatpush3.msra.mxu0 %v630_v41 }
  0x31   : > { %880 = vmatprep.subr.mxu0 %v1005_v39 }
  0x32   : > { %881 = vmatpush3.msra.mxu0 %v629_v42 }
  0x33   : > { %882 = vmatprep.subr.mxu0 %v1005_v39 }
  0x34   : > { %883 = vmatpush3.msra.mxu0 %v628_v43 }
  0x35   : > { %884 = vmatprep.subr.mxu0 %v1005_v39 }
  0x36   : > { %885 = vmatpush3.msra.mxu0 %v627_v44 }
  0xdc   : > { %v856_v45 = vpop.f32.mrf.mxu1 }
  0xde   : > { %v403_v46 = vpop.f32.mrf.mxu1 }
  0xe0   : > { %v857_v47 = vpop.f32.mrf.mxu1 }
  0xe2   : > { %v406_v48 = vpop.f32.mrf.mxu1 }
  0xe3   : > { %v848_v49 = vpop.f32.mrf.mxu0 }
  0xe4   : > { %v412_v55 = vadd.f32 %v856_v45, %v848_v49 }
  0xe5   : > { %v339_v50 = vpop.f32.mrf.mxu0  ;;  %v872_v51 = vpop.f32.mrf.mxu1 }
  0xe6   : > { %v404_v58 = vadd.f32 %v403_v46, %v339_v50 }
  0xe7   : > { %v849_v52 = vpop.f32.mrf.mxu0  ;;  %v578_v53 = vpop.f32.mrf.mxu1 }
  0xe9   : > { %v342_v54 = vpop.f32.mrf.mxu0  ;;  %v873_v56 = vpop.f32.mrf.mxu1 }
  0xea   : > { %v407_v1 = vadd.f32 %v406_v48, %v342_v54 }
  0xeb   : > { %v864_v57 = vpop.f32.mrf.mxu0  ;;  %v581_v7 = vpop.f32.mrf.mxu1 }
  0xec   : > { %v502_v59 = vadd.f32 %v864_v57, %v412_v55 }
  0xed   : > { %v486_v60 = vpop.f32.mrf.mxu0 }
  0xee   : > { %v594_v61 = vadd.f32 %v872_v51, %v502_v59  ;;  %v500_v62 = vadd.f32 %v486_v60, %v404_v58 }
  0xef   : > { %v865_v0 = vpop.f32.mrf.mxu0 }
  0xf0   : > { %v592_v2 = vadd.f32 %v578_v53, %v500_v62  ;;  %v604_v4 = vadd.f32 %v814_v63, %v594_v61 }
  0xf1   : > { %v489_v3 = vpop.f32.mrf.mxu0 }
  0xf2   : > { %v602_v5 = vadd.f32 %v814_v63, %v592_v2  ;;  %v501_v6 = vadd.f32 %v489_v3, %v407_v1  ;;  %v607_v11 = vmax.f32 %v604_v4, 0.0 }
  0xf4   : > { %v605_v8 = vmax.f32 %v602_v5, 0.0  ;;  %v593_v9 = vadd.f32 %v581_v7, %v501_v6  ;;  %v613_v17 = vmul.f32 %v610_v13, %v607_v11 }
  0xf6   : > { %v603_v12 = vadd.f32 %v814_v63, %v593_v9  ;;  %v611_v15 = vmul.f32 %v608_v10, %v605_v8  ;;  %v618_v22 = vsel %vm617_vm6, %v613_v17, -inf }
  0xf8   : > { %v606_v16 = vmax.f32 %v603_v12, 0.0  ;;  %v615_v19 = vsel %vm614_vm5, %v611_v15, -inf }
  0xfa   : > { %v612_v18 = vmul.f32 %v609_v14, %v606_v16 }
  0xfc   : > { %v616_v20 = vsel %vm614_vm5, %v612_v18, -inf }
  0xfd   : > { %v619_v21 = vmax.f32 %v615_v19, %v616_v20 }
  0xff   : > { %v620_v23 = vmax.f32 %v619_v21, %v618_v22 }
 0x101   : > { %v621_v24 = vrot.slane %v620_v23, 4 }
 0x103   : > { %v622_v25 = vmax.f32 %v620_v23, %v621_v24 }
 0x105   : > { %v623_v26 = vrot.slane %v622_v25, 2 }
 0x107   : > { %v624_v27 = vmax.f32 %v622_v25, %v623_v26 }
 0x109   : > { %v625_v28 = vrot.slane %v624_v27, 1 }
 0x10b   : > { %v626_v29 = vmax.f32 %v624_v27, %v625_v28 }
 0x10d   : > { %887 = vmatmul.mubr.msk.f32.vlgmr.msra.gmra.mxu0 %vm614_vm5, %v626_v29 }
 0x1cd   : > { %v703_v31 = vpop.f32.mrf.mxu0 }
 0x1ce   : > { %v704_v32 = vadd.f32 %v703_v31, %v633_v30 }
 0x1cf   : > { %v888_v33 = vpop.f32.mrf.mxu0 }
 0x1d0   : > { %708 = vst.msk [vmem:[%s243_s9] sm:$0x1] %vm707_vm7, %v704_v32 }
 0x1d1   : > { %956 = shalt.err (!%p953_p3)
}
 0x1d2   : > { %s957_s18 = scalar_lea.hbm %s1168_s13, 16  ;;  %s961_s26 = scalar_lea.hbm %s1209_s6, 32 }
 0x1d3   : > { %p958_p4 = scmp.ne.s32.totalorder %s1168_s13, %s957_s18  ;;  %p962_p9 = scmp.lt.s32.totalorder %s1168_s13, %s1209_s6 }
 0x1d4   : > { %p963_p10 = scmp.lt.s32.totalorder %s961_s26, %s957_s18 }
 0x1d5   : > { %p959_p7 = pnand %p958_p4, %p1081_p5 }
 0x1d6   : > { %p964_p11 = por %p963_p10, %p962_p9 }
 0x1d7   : > { %p960_p8 = pneg %p959_p7 }
 0x1d9   : > { %p965_p12 = pnand %p964_p11, %p960_p8 }
 0x1db   : > { %968 = shalt.err (!%p965_p12)
}
 0x1dc   : > { %890 = dma.vmem_to_hbm [thread:$0]  (%p1081_p5), %s723_s10, 16, %s1168_s13, %s710_s14  }
 0x1dd PF: > { %p896_p13 = scmp.ge.s32.totalorder %s1003_s24, 2  ;;  %s734_s9 = sand.u32 1, %s991_s21  }
 0x1de   : > { %s735_s11 = scalar_lea.sflag [#allocation3], %s734_s9 }
 0x1df   : > { %p893_p0 = pnand %p896_p13, %p1085_p6 }
 0x1e1   : > { %p894_p1 = pneg %p893_p0 }
 0x1e3   : > { %986 = dma.done.wait (%p894_p1), %s735_s11, 16  }
 0x1e4   : > { %988 = vsyncadd (%p894_p1), %s735_s11, 4294967280  ;;  %p16_p2 = scmp.ge.s32.totalorder %s1068_s27, 4   ;;  %s1212_s21 = smov %s995_s22 }
 0x1e5   : > { %s1213_s22 = smov %s999_s23  ;;  %s1214_s23 = smov %s1079_s30 }
 0x1e6   : > { %s1215_s24 = smov %s1068_s27  ;;  %18 = sbr.rel (!%p16_p2) target bundleno = 3 (0x3), region = 82 }
 0x1eb   :  { %739 = vsyncpa [#allocation3], 1 }
 0x1ec   :  { %741 = vsyncpa [#allocation3 + $0x1], 1 }

</bundles_post_ra>
